<compile_context>
chip_gen: v6e
topology: v6e:2x2x1
jax: 0.10.0
libtpu: 0.0.40
codegen_flags: <defaults>
</compile_context>

<pallas_src>
import functools

import jax
import jax.numpy as jnp
from jax.experimental import pallas as pl
from jax.experimental.pallas import tpu as pltpu

POWER = 2
TARGET_TILE_BYTES = 4 * 1024 * 1024     # per input buffer (Pallas double-buffers it)
DEFAULT_MAX_TILE_ROWS = 4096


def _round_up(x, m):
    return (x + m - 1) // m * m


def _choose_row_tile(n_rows, lane_width, max_rows):
    fit = (TARGET_TILE_BYTES // (lane_width * 4)) // 8 * 8
    max_rows = max(8, max_rows // 8 * 8)
    return max(8, min(max_rows, max(fit, 8), _round_up(n_rows, 8)))


def _emb_margin_kernel(x_ref, o_ref, *, power, n_rows, row_tile, groups, dim,
                       tiles_per_p):
    """One (row_tile, lane) tile.  The (1, row_tile, 1) output block is
    resident across the reduction axis and acts as the accumulator."""
    p = pl.program_id(0)
    i = pl.program_id(1)

    @pl.when(i == 0)
    def _():
        o_ref[...] = jnp.zeros_like(o_ref)

    x = x_ref[...].astype(jnp.float32)            # (row_tile, lane)
    sq = x ** power                               # static int power -> VPU mults

    if groups == 1:
        norm = jnp.sum(sq, axis=1, keepdims=True)             # (row_tile, 1)
        hinge = jnp.maximum(norm - 1.0, 0.0)
    else:
        # Lane-dense packing: each tile row holds `groups` original embedding
        # rows of width `dim`; reduce each contiguous lane chunk separately.
        hinge = jnp.zeros((row_tile, 1), jnp.float32)
        for g in range(groups):                   # static unroll, groups <= 8
            norm_g = jnp.sum(sq[:, g * dim:(g + 1) * dim], axis=1, keepdims=True)
            hinge = hinge + jnp.maximum(norm_g - 1.0, 0.0)

    # Mask rows past the end of the table (tail tile / over-sized grid).
    row0 = (p * tiles_per_p + i) * row_tile
    rows = row0 + jax.lax.broadcasted_iota(jnp.int32, (row_tile, 1), 0)
    hinge = jnp.where(rows < n_rows, hinge, 0.0)

    o_ref[...] += hinge[None]                     # (1, row_tile, 1)


def _emb_margin_single(embedding, *, power, max_tile_rows):
    emb = jnp.asarray(embedding)
    assert emb.ndim == 2, "EmbMarginLoss kernel expects 2-D [rows, dim] embeddings"
    n, d = emb.shape

    # Lane-dense view for small embedding dims (free row-major reshape).
    if d < 128 and 128 % d == 0 and n % (128 // d) == 0:
        groups = 128 // d
    else:
        groups = 1
    n_rows = n // groups
    lane = d * groups
    x = emb.reshape(n_rows, lane)

    row_tile = _choose_row_tile(n_rows, lane, max_tile_rows)
    num_tiles = pl.cdiv(n_rows, row_tile)
    n_parallel = 2 if num_tiles >= 2 else 1       # feed both TensorCores on v7x
    tiles_per_p = pl.cdiv(num_tiles, n_parallel)

    def in_index(p_idx, i_idx):
        # Clamp so a core's trailing (empty) tiles re-read a valid block;
        # the in-kernel row mask zeroes their contribution.
        t = jnp.minimum(p_idx * tiles_per_p + i_idx, num_tiles - 1)
        return (t, 0)

    kernel = functools.partial(
        _emb_margin_kernel, power=power, n_rows=n_rows, row_tile=row_tile,
        groups=groups, dim=d, tiles_per_p=tiles_per_p)

    out = pl.pallas_call(
        kernel,
        out_shape=jax.ShapeDtypeStruct((n_parallel, row_tile, 1), jnp.float32),
        grid_spec=pltpu.PrefetchScalarGridSpec(
            num_scalar_prefetch=0,
            grid=(n_parallel, tiles_per_p),
            in_specs=[pl.BlockSpec((row_tile, lane), in_index)],
            out_specs=pl.BlockSpec((1, row_tile, 1),
                                   lambda p_idx, i_idx: (p_idx, 0, 0)),
        ),
        compiler_params=pltpu.CompilerParams(
            dimension_semantics=("parallel", "arbitrary"),
            vmem_limit_bytes=32 * 1024 * 1024,
        ),
    )(x)
    # Tiny final reduction (P * row_tile values) done in XLA.
    return jnp.sum(out)


def emb_margin_loss(*embeddings, power=POWER, max_tile_rows=DEFAULT_MAX_TILE_ROWS):
    """JAX/Pallas equivalent of EmbMarginLoss(power).forward(*embeddings)."""
    # TODO(synk): tables sharing the same width could be fused into a single
    # pallas_call to amortize launch overhead; kept per-table here to avoid an
    # HBM concatenate copy.
    loss = jnp.float32(0.0)
    for emb in embeddings:
        loss = loss + _emb_margin_single(emb, power=power,
                                         max_tile_rows=max_tile_rows)
    return loss


def _reference(*embeddings, power=POWER):
    loss = jnp.float32(0.0)
    for emb in embeddings:
        norm_e = jnp.sum(jnp.asarray(emb, jnp.float32) ** power, axis=1, keepdims=True)
        loss = loss + jnp.sum(jnp.maximum(norm_e - 1.0, 0.0))
    return loss


if __name__ == "__main__":
    key = jax.random.PRNGKey(0)
    k1, k2, k3, k4 = jax.random.split(key, 4)

    # Small, deterministic "embedding lookups" (rows = batch of looked-up ids).
    user_e = jax.random.normal(k1, (16, 32), dtype=jnp.float32) * 0.8  # lane-dense (k=4)
    item_e = jax.random.normal(k2, (16, 32), dtype=jnp.float32) * 0.8  # lane-dense (k=4)
    rel_e = jax.random.normal(k3, (10, 16), dtype=jnp.float32) * 0.8   # fallback + tail mask
    ent_e = jax.random.normal(k4, (50, 16), dtype=jnp.float32) * 0.8   # fallback, ragged rows

    embs = (user_e, item_e, rel_e, ent_e)
    ref = jax.block_until_ready(_reference(*embs))

    out = jax.block_until_ready(emb_margin_loss(*embs))
    assert jnp.allclose(out, ref, rtol=1e-5, atol=1e-5), (out, ref)

    # Force tiny tiles to exercise the multi-tile reduction + two-way
    # parallel-axis path (same code path used for large tables).
    out_tiled = jax.block_until_ready(emb_margin_loss(*embs, max_tile_rows=8))
    assert jnp.allclose(out_tiled, ref, rtol=1e-5, atol=1e-5), (out_tiled, ref)

    print("KERNEL_OK")
</pallas_src>

<mosaic_0001>
module attributes {stable_mosaic.version = 11 : i64} {
  func.func @_emb_margin_kernel(%arg0: i32, %arg1: i32, %arg2: memref<8x128xf32, #tpu.memory_space<vmem>>, %arg3: memref<1x8x1xf32, #tpu.memory_space<vmem>>) attributes {dimension_semantics = [#tpu.dimension_semantics<parallel>, #tpu.dimension_semantics<arbitrary>], iteration_bounds = array<i64: 1, 1>, scalar_prefetch = 0 : i64, scratch_operands = 0 : i64, tpu.core_type = #tpu.core_type<tc>, window_params = [{transform_indices = @transform_0, window_bounds = array<i64: 8, 128>}, {transform_indices = @transform_1, window_bounds = array<i64: 1, 8, 1>}]} {
    %c0_i32 = arith.constant 0 : i32
    %0 = arith.cmpi eq, %arg1, %c0_i32 : i32
    %1 = arith.extui %0 : i1 to i32
    %c0_i32_0 = arith.constant 0 : i32
    %2 = arith.cmpi ne, %1, %c0_i32_0 : i32
    scf.if %2 {
      %cst_21 = arith.constant 0.000000e+00 : f32
      %52 = vector.broadcast %cst_21 : f32 to vector<1x8x1xf32>
      %c0_22 = arith.constant 0 : index
      %c0_23 = arith.constant 0 : index
      %c0_24 = arith.constant 0 : index
      %53 = vector.load %arg3[%c0_22, %c0_23, %c0_24] : memref<1x8x1xf32, #tpu.memory_space<vmem>>, vector<1x8x1xf32>
      tpu.vector_store %arg3[%c0_22, %c0_23, %c0_24], %52 {strides = array<i32>} : memref<1x8x1xf32, #tpu.memory_space<vmem>>, vector<1x8x1xf32>,
    } else {
    }
    %c0 = arith.constant 0 : index
    %c0_1 = arith.constant 0 : index
    %3 = vector.load %arg2[%c0, %c0_1] : memref<8x128xf32, #tpu.memory_space<vmem>>, vector<8x128xf32>
    %4 = arith.mulf %3, %3 : vector<8x128xf32>
    %cst = arith.constant 0.000000e+00 : f32
    %5 = vector.broadcast %cst : f32 to vector<8x1xf32>
    %6 = vector.extract_strided_slice %4 {offsets = [0, 0], sizes = [8, 32], strides = [1, 1]} : vector<8x128xf32> to vector<8x32xf32>
    %cst_2 = arith.constant dense<0.000000e+00> : vector<8xf32>
    %7 = vector.multi_reduction <add>, %6, %cst_2 [1] : vector<8x32xf32> to vector<8xf32>
    %8 = vector.shape_cast %7 : vector<8xf32> to vector<8x1xf32>
    %cst_3 = arith.constant 1.000000e+00 : f32
    %9 = vector.broadcast %cst_3 : f32 to vector<8x1xf32>
    %10 = arith.subf %8, %9 : vector<8x1xf32>
    %cst_4 = arith.constant 0.000000e+00 : f32
    %11 = vector.broadcast %cst_4 : f32 to vector<8x1xf32>
    %12 = arith.maximumf %10, %11 : vector<8x1xf32>
    %13 = arith.addf %5, %12 : vector<8x1xf32>
    %14 = vector.extract_strided_slice %4 {offsets = [0, 32], sizes = [8, 32], strides = [1, 1]} : vector<8x128xf32> to vector<8x32xf32>
    %cst_5 = arith.constant dense<0.000000e+00> : vector<8xf32>
    %15 = vector.multi_reduction <add>, %14, %cst_5 [1] : vector<8x32xf32> to vector<8xf32>
    %16 = vector.shape_cast %15 : vector<8xf32> to vector<8x1xf32>
    %cst_6 = arith.constant 1.000000e+00 : f32
    %17 = vector.broadcast %cst_6 : f32 to vector<8x1xf32>
    %18 = arith.subf %16, %17 : vector<8x1xf32>
    %cst_7 = arith.constant 0.000000e+00 : f32
    %19 = vector.broadcast %cst_7 : f32 to vector<8x1xf32>
    %20 = arith.maximumf %18, %19 : vector<8x1xf32>
    %21 = arith.addf %13, %20 : vector<8x1xf32>
    %22 = vector.extract_strided_slice %4 {offsets = [0, 64], sizes = [8, 32], strides = [1, 1]} : vector<8x128xf32> to vector<8x32xf32>
    %cst_8 = arith.constant dense<0.000000e+00> : vector<8xf32>
    %23 = vector.multi_reduction <add>, %22, %cst_8 [1] : vector<8x32xf32> to vector<8xf32>
    %24 = vector.shape_cast %23 : vector<8xf32> to vector<8x1xf32>
    %cst_9 = arith.constant 1.000000e+00 : f32
    %25 = vector.broadcast %cst_9 : f32 to vector<8x1xf32>
    %26 = arith.subf %24, %25 : vector<8x1xf32>
    %cst_10 = arith.constant 0.000000e+00 : f32
    %27 = vector.broadcast %cst_10 : f32 to vector<8x1xf32>
    %28 = arith.maximumf %26, %27 : vector<8x1xf32>
    %29 = arith.addf %21, %28 : vector<8x1xf32>
    %30 = vector.extract_strided_slice %4 {offsets = [0, 96], sizes = [8, 32], strides = [1, 1]} : vector<8x128xf32> to vector<8x32xf32>
    %cst_11 = arith.constant dense<0.000000e+00> : vector<8xf32>
    %31 = vector.multi_reduction <add>, %30, %cst_11 [1] : vector<8x32xf32> to vector<8xf32>
    %32 = vector.shape_cast %31 : vector<8xf32> to vector<8x1xf32>
    %cst_12 = arith.constant 1.000000e+00 : f32
    %33 = vector.broadcast %cst_12 : f32 to vector<8x1xf32>
    %34 = arith.subf %32, %33 : vector<8x1xf32>
    %cst_13 = arith.constant 0.000000e+00 : f32
    %35 = vector.broadcast %cst_13 : f32 to vector<8x1xf32>
    %36 = arith.maximumf %34, %35 : vector<8x1xf32>
    %37 = arith.addf %29, %36 : vector<8x1xf32>
    %c1_i32 = arith.constant 1 : i32
    %38 = arith.muli %arg0, %c1_i32 : i32
    %39 = arith.addi %38, %arg1 : i32
    %c8_i32 = arith.constant 8 : i32
    %40 = arith.muli %39, %c8_i32 : i32
    %41 = tpu.iota {dimensions = array<i32: 0>} : vector<8x1xi32>
    %42 = vector.broadcast %40 : i32 to vector<8x1xi32>
    %43 = arith.addi %42, %41 : vector<8x1xi32>
    %c4_i32 = arith.constant 4 : i32
    %44 = vector.broadcast %c4_i32 : i32 to vector<8x1xi32>
    %45 = arith.cmpi slt, %43, %44 : vector<8x1xi32>
    %cst_14 = arith.constant 0.000000e+00 : f32
    %46 = vector.broadcast %cst_14 : f32 to vector<8x1xf32>
    %47 = arith.select %45, %37, %46 : vector<8x1xi1>, vector<8x1xf32>
    %c0_15 = arith.constant 0 : index
    %c0_16 = arith.constant 0 : index
    %c0_17 = arith.constant 0 : index
    %48 = vector.load %arg3[%c0_15, %c0_16, %c0_17] : memref<1x8x1xf32, #tpu.memory_space<vmem>>, vector<1x8x1xf32>
    %49 = vector.shape_cast %47 : vector<8x1xf32> to vector<1x8x1xf32>
    %50 = arith.addf %48, %49 : vector<1x8x1xf32>
    %c0_18 = arith.constant 0 : index
    %c0_19 = arith.constant 0 : index
    %c0_20 = arith.constant 0 : index
    %51 = vector.load %arg3[%c0_18, %c0_19, %c0_20] : memref<1x8x1xf32, #tpu.memory_space<vmem>>, vector<1x8x1xf32>
    tpu.vector_store %arg3[%c0_18, %c0_19, %c0_20], %50 {strides = array<i32>} : memref<1x8x1xf32, #tpu.memory_space<vmem>>, vector<1x8x1xf32>,
    return
  }
  func.func @transform_0(%arg0: i32, %arg1: i32) -> (i32, i32) {
    %c1_i32 = arith.constant 1 : i32
    %0 = arith.muli %arg0, %c1_i32 : i32
    %1 = arith.addi %0, %arg1 : i32
    %c0_i32 = arith.constant 0 : i32
    %2 = arith.minsi %1, %c0_i32 : i32
    %c0_i32_0 = arith.constant 0 : i32
    %c0_i32_1 = arith.constant 0 : i32
    return %2, %c0_i32_0 : i32, i32
  }
  func.func @transform_1(%arg0: i32, %arg1: i32) -> (i32, i32, i32) {
    %c0_i32 = arith.constant 0 : i32
    %c0_i32_0 = arith.constant 0 : i32
    %c0_i32_1 = arith.constant 0 : i32
    return %arg0, %c0_i32, %c0_i32_0 : i32, i32, i32
  }
}

</mosaic_0001>

<bundles_post_ra>
// kernel: tpu_custom_call.1
= control target key start
LH: loop header
LB: loop body
LE: loop exit
PB: predicated region body
PF: predicated region fallthrough
CT: control target
= control target key end

     0   :  { %6 = vsyncpa [#allocation3], 0  ;;  %s162_s0 = inlined_call_operand.hbm [shape: f32[4,128], index: 0, kind: input, shape index: {}]   ;;  %s163_s1 = inlined_call_operand.vmem [shape: f32[1,8,1], index: 1, kind: output, shape index: {}]  }
   0x1   :  { %17 = vsyncadd [#allocation3], 64  ;;  %s132_s6 = smov [#allocation2]  }
   0x2   :  { %s22_s7 = sshll.u32 %s132_s6, 4  ;;  %s23_s7 = int_to_ptr.vmem [resolvable:$true] %s22_s7 }
   0x3   :  { %s118_s8 = scalar_lea.vmem %s23_s7, 64  ;;  %s122_s9 = scalar_lea.vmem %s23_s7, 128 }
   0x4   :  { %p119_p0 = scmp.ne.s32.totalorder %s23_s7, %s118_s8  ;;  %p123_p1 = scmp.lt.s32.totalorder %s23_s7, %s23_s7 }
   0x5   :  { %p124_p2 = scmp.lt.s32.totalorder %s122_s9, %s118_s8 }
   0x7   :  { %p125_p3 = por %p124_p2, %p123_p1 }
   0x9   :  { %p126_p4 = pnand %p125_p3, %p119_p0 }
   0xb   :  { %129 = shalt.err (!%p126_p4)
}
   0xc   :  { %s133_s10 = smov 64   ;;  %s134_s11 = smov 4  }
   0xd   :  { %28 = dma.hbm_to_vmem [thread:$0]  %s162_s0, 64, %s23_s7, [#allocation3], %s133_s10, %s133_s10, %s134_s11  }
   0xe   :  { %130 = dma.done.wait [#allocation3], 128  }
   0xf   :  { %131 = vsyncadd [#allocation3], 4294967168  ;;  %vm42_vm0 = vcmask 7168   ;;  %v135_v0 = vmov 0.0   ;;  %v44_v1 = vld [vmem:[#allocation2] sm:$0xff]  ;;  %s136_s16 = smov 96   ;;  %v83_v15 = vlaneseq }
  0x10   :  { %43 = vst.msk [vmem:[%s163_s1] sm:$0xff] %vm42_vm0, %v135_v0  ;;  %v45_v2 = vmul.f32 %v44_v1, %v44_v1  ;;  %s137_s17 = smov 32   ;;  %vm46_vm1 = vcmask 261120  }
  0x11   :  { %v84_v21 = vshrl.u32 %v83_v15, 7 }
  0x12   :  { %54 = vrot.lane.b32.xlu0 %v45_v2, %s136_s16  ;;  %72 = vrot.lane.b32.xlu1 %v45_v2, %s137_s17  ;;  %v47_v3 = vsel %vm46_vm1, %v45_v2, 0.0 }
  0x13   :  { %vm87_vm2 = vcmp.lt.s32.totalorder %v84_v21, 4 }
  0x16   :  { %63 = vrot.lane.b32.xlu0 %v45_v2, %s133_s10 }
  0x17   :  { %v89_v27 = vld [vmem:[%s163_s1] sm:$0xff] }
  0x36   :  { %48 = vadd.xlane.f32.xlu1 %v47_v3 }
  0x84   :  { %v55_v4 = vpop.permute.xlu0 %54  ;;  %v73_v5 = vpop.permute.xlu1 %72 }
  0x85   :  { %v57_v6 = vsel %vm46_vm1, %v55_v4, 0.0  ;;  %v75_v7 = vsel %vm46_vm1, %v73_v5, 0.0 }
  0x86   :  { %58 = vadd.xlane.f32.xlu0 %v57_v6  ;;  %76 = vadd.xlane.f32.xlu1 %v75_v7 }
  0x88   :  { %v64_v8 = vpop.permute.xlu0 %63 }
  0x89   :  { %v66_v9 = vsel %vm46_vm1, %v64_v8, 0.0 }
  0x8a   :  { %67 = vadd.xlane.f32.xlu0 %v66_v9 }
  0xbf   :  { %v49_v10 = vpop.xlane.xlu1 %48 }
  0xc0   :  { %v100_v11 = vadd.f32 -1.0, %v49_v10 }
  0xc2   :  { %v51_v17 = vmax.f32 %v100_v11, 0.0 }
 0x10f   :  { %v59_v12 = vpop.xlane.xlu0 %58  ;;  %v77_v13 = vpop.xlane.xlu1 %76 }
 0x110   :  { %v101_v14 = vadd.f32 -1.0, %v59_v12  ;;  %v103_v18 = vadd.f32 -1.0, %v77_v13 }
 0x112   :  { %v61_v16 = vmax.f32 %v101_v14, 0.0  ;;  %v79_v24 = vmax.f32 %v103_v18, 0.0 }
 0x113   :  { %v68_v19 = vpop.xlane.xlu0 %67 }
 0x114   :  { %v102_v20 = vadd.f32 -1.0, %v68_v19  ;;  %v62_v22 = vadd.f32 %v61_v16, %v51_v17 }
 0x116   :  { %v70_v23 = vmax.f32 %v102_v20, 0.0 }
 0x118   :  { %v71_v25 = vadd.f32 %v70_v23, %v62_v22 }
 0x11a   :  { %v80_v26 = vadd.f32 %v79_v24, %v71_v25 }
 0x11c   :  { %v88_v28 = vsel %vm87_vm2, %v80_v26, 0.0 }
 0x11d   :  { %v90_v29 = vadd.f32 %v89_v27, %v88_v28 }
 0x11f   :  { %92 = vst.msk [vmem:[%s163_s1] sm:$0xff] %vm42_vm0, %v90_v29 }
 0x120   :  { %97 = vsyncpa [#allocation3], 1 }

</bundles_post_ra>
